<compile_context>
chip_gen: v7x
topology: tpu7x:2x2x1
jax: 0.10.0
libtpu: 0.0.40
codegen_flags: <defaults>
</compile_context>

<pallas_src>
import jax
import jax.numpy as jnp
from jax.experimental import pallas as pl
from jax.experimental.pallas import tpu as pltpu


def _round_up(n, m):
    return ((n + m - 1) // m) * m


def _dropout_linear_kernel(x_ref, w_ref, b_ref, o_ref):
    # Eval-mode dropout == identity -> the hot path is one MXU matmul per tile.
    # Accumulate in f32, add bias in f32 (VPU work hidden under the matmul),
    # then cast to the output dtype (lane-dense store: tn is a 128 multiple).
    acc = jnp.dot(x_ref[...], w_ref[...], preferred_element_type=jnp.float32)
    o_ref[...] = (acc + b_ref[...].astype(jnp.float32)).astype(o_ref.dtype)


def standard_network_forward(x, weight_t_padded, bias_padded, num_classes,
                             *, compute_dtype=None):
    """x: (B, D_in) -> (B, num_classes).

    weight_t_padded: (D_in, N_pad) transposed Linear weight, zero-padded in N only.
    bias_padded:     (1, N_pad)    zero-padded Linear bias.
    """
    B, D_in = x.shape
    Kw, N_pad = weight_t_padded.shape
    assert Kw == D_in
    assert bias_padded.shape == (1, N_pad)
    assert N_pad % 128 == 0 and num_classes <= N_pad

    if compute_dtype is not None:
        x = x.astype(compute_dtype)
        weight_t_padded = weight_t_padded.astype(compute_dtype)
        bias_padded = bias_padded.astype(compute_dtype)
    dtype = x.dtype
    itemsize = jnp.dtype(dtype).itemsize
    sub = 8 if itemsize >= 4 else 16  # f32 sublane tile is 8 rows, bf16 packs 16

    # ---- tile selection (budget leaves headroom under v7x's 64 MiB per-TC VMEM)
    VMEM_BUDGET = 48 * 1024 * 1024
    tb = min(512, _round_up(B, sub))

    def vmem_bytes(tb_, tn_):
        n_tiles = pl.cdiv(N_pad, tn_)
        wb = 1 if n_tiles == 1 else 2          # resident (single-buffered) vs streamed
        w = D_in * tn_ * itemsize * wb
        bia = tn_ * itemsize * wb
        xb = 2 * tb_ * D_in * itemsize         # double-buffered x tiles
        ob = 2 * tb_ * tn_ * itemsize          # double-buffered out tiles
        return w + bia + xb + ob

    tn = min(N_pad, 2048)
    for cand in (2048, 1024, 512, 256, 128):
        c = min(N_pad, cand)
        if vmem_bytes(tb, c) <= VMEM_BUDGET or c == 128:
            tn = c
            break
    while vmem_bytes(tb, tn) > VMEM_BUDGET and tb > sub:
        tb = max(sub, _round_up(tb // 2, sub))

    grid = (pl.cdiv(B, tb), pl.cdiv(N_pad, tn))
    single_n_tile = grid[1] == 1
    vmem_limit = int(min(max(2 * vmem_bytes(tb, tn), 32 * 1024 * 1024),
                         64 * 1024 * 1024))

    x_spec = pl.BlockSpec((tb, D_in), lambda i, j: (i, 0))
    out_spec = pl.BlockSpec((tb, tn), lambda i, j: (i, j))

    def run(resident):
        if resident:
            # Constant index_map -> the block stays in VMEM; one buffer is enough.
            w_spec = pl.BlockSpec((D_in, tn), lambda i, j: (0, j),
                                  pipeline_mode=pl.Buffered(1))
            b_spec = pl.BlockSpec((1, tn), lambda i, j: (0, j),
                                  pipeline_mode=pl.Buffered(1))
        else:
            w_spec = pl.BlockSpec((D_in, tn), lambda i, j: (0, j))
            b_spec = pl.BlockSpec((1, tn), lambda i, j: (0, j))
        return pl.pallas_call(
            _dropout_linear_kernel,
            out_shape=jax.ShapeDtypeStruct((B, N_pad), dtype),
            grid_spec=pl.GridSpec(
                grid=grid,
                in_specs=[x_spec, w_spec, b_spec],
                out_specs=out_spec,
            ),
            compiler_params=pltpu.CompilerParams(
                dimension_semantics=("parallel", "parallel"),
                vmem_limit_bytes=vmem_limit,
            ),
        )(x, weight_t_padded, bias_padded)

    if single_n_tile:
        try:
            out_padded = run(resident=True)
        except Exception:
            # Fallback if single-buffered pipeline_mode is rejected by this JAX build.
            out_padded = run(resident=False)
    else:
        out_padded = run(resident=False)

    # Only the class-lane slice remains (batch is not padded). A consumer that
    # tolerates padded (zero-weight) classes could skip this copy entirely.
    return out_padded[:, :num_classes]


def init_standard_network_params(key, embedding_size, num_classes):
    """Mirror nn.Linear default init (U(-1/sqrt(in), 1/sqrt(in)))."""
    k_w, k_b = jax.random.split(key)
    bound = 1.0 / (embedding_size ** 0.5)
    # PyTorch weight is (out, in); stored transposed (in, out) for x @ W.
    weight_t = jax.random.uniform(
        k_w, (embedding_size, num_classes), jnp.float32, -bound, bound)
    bias = jax.random.uniform(k_b, (1, num_classes), jnp.float32, -bound, bound)

    # Pad only the class (lane) axis to a 128 multiple; feature axis stays natural.
    N_pad = _round_up(num_classes, 128)
    weight_t_padded = jnp.zeros((embedding_size, N_pad), jnp.float32)
    weight_t_padded = weight_t_padded.at[:, :num_classes].set(weight_t)
    bias_padded = jnp.zeros((1, N_pad), jnp.float32)
    bias_padded = bias_padded.at[:, :num_classes].set(bias)
    return weight_t, bias, weight_t_padded, bias_padded


if __name__ == "__main__":
    key = jax.random.PRNGKey(0)
    k_x, k_p = jax.random.split(key)

    # Small but non-degenerate shapes:
    #   - embedding_size=96 is NOT 128-aligned -> exercises the no-feature-padding path,
    #   - num_classes=10 is padded to 128 lanes inside the params only.
    batch = 200
    embedding_size = 96
    num_classes = 10

    x = jax.random.normal(k_x, (batch, embedding_size), jnp.float32)
    weight_t, bias, weight_t_padded, bias_padded = init_standard_network_params(
        k_p, embedding_size, num_classes)

    out = standard_network_forward(x, weight_t_padded, bias_padded, num_classes)
    out = jax.block_until_ready(out)

    # Reference in plain JAX (eval-mode dropout == identity).
    ref = x @ weight_t + bias
    assert out.shape == (batch, num_classes)
    assert jnp.allclose(out, ref, atol=1e-5, rtol=1e-5)

    print("KERNEL_OK")
</pallas_src>

<mosaic_0001>
module attributes {stable_mosaic.version = 11 : i64} {
  func.func @_dropout_linear_kernel(%arg0: i32, %arg1: i32, %arg2: memref<200x96xf32, #tpu.memory_space<vmem>>, %arg3: memref<96x128xf32, #tpu.memory_space<vmem>>, %arg4: memref<1x128xf32, #tpu.memory_space<vmem>>, %arg5: memref<200x128xf32, #tpu.memory_space<vmem>>) attributes {dimension_semantics = [#tpu.dimension_semantics<parallel>, #tpu.dimension_semantics<parallel>], iteration_bounds = array<i64: 1, 1>, scalar_prefetch = 0 : i64, scratch_operands = 0 : i64, tpu.core_type = #tpu.core_type<tc>, window_params = [{transform_indices = @transform_0, window_bounds = array<i64: 200, 96>}, {pipeline_mode = #tpu.pipeline_mode<synchronous>, transform_indices = @transform_1, window_bounds = array<i64: 96, 128>}, {pipeline_mode = #tpu.pipeline_mode<synchronous>, transform_indices = @transform_2, window_bounds = array<i64: 1, 128>}, {transform_indices = @transform_3, window_bounds = array<i64: 200, 128>}]} {
    %c0 = arith.constant 0 : index
    %c0_0 = arith.constant 0 : index
    %0 = vector.load %arg2[%c0, %c0_0] : memref<200x96xf32, #tpu.memory_space<vmem>>, vector<200x96xf32>
    %c0_1 = arith.constant 0 : index
    %c0_2 = arith.constant 0 : index
    %1 = vector.load %arg3[%c0_1, %c0_2] : memref<96x128xf32, #tpu.memory_space<vmem>>, vector<96x128xf32>
    %cst = arith.constant dense<0.000000e+00> : vector<200x128xf32>
    %2 = tpu.matmul %0, %1, %cst {dimension_numbers = #tpu.dot_dimension_numbers<[1], [0], [0], [1], [0, 0, 1, 1], [], []>} : vector<200x96xf32>, vector<96x128xf32>, vector<200x128xf32> -> vector<200x128xf32>
    %c0_3 = arith.constant 0 : index
    %c0_4 = arith.constant 0 : index
    %3 = vector.load %arg4[%c0_3, %c0_4] : memref<1x128xf32, #tpu.memory_space<vmem>>, vector<1x128xf32>
    %4 = vector.broadcast %3 : vector<1x128xf32> to vector<200x128xf32>
    %5 = arith.addf %2, %4 : vector<200x128xf32>
    %c0_5 = arith.constant 0 : index
    %c0_6 = arith.constant 0 : index
    %6 = vector.load %arg5[%c0_5, %c0_6] : memref<200x128xf32, #tpu.memory_space<vmem>>, vector<200x128xf32>
    tpu.vector_store %arg5[%c0_5, %c0_6], %5 {strides = array<i32>} : memref<200x128xf32, #tpu.memory_space<vmem>>, vector<200x128xf32>,
    return
  }
  func.func @transform_0(%arg0: i32, %arg1: i32) -> (i32, i32) {
    %c0_i32 = arith.constant 0 : i32
    %c0_i32_0 = arith.constant 0 : i32
    return %arg0, %c0_i32 : i32, i32
  }
  func.func @transform_1(%arg0: i32, %arg1: i32) -> (i32, i32) {
    %c0_i32 = arith.constant 0 : i32
    %c0_i32_0 = arith.constant 0 : i32
    return %c0_i32, %arg1 : i32, i32
  }
  func.func @transform_2(%arg0: i32, %arg1: i32) -> (i32, i32) {
    %c0_i32 = arith.constant 0 : i32
    %c0_i32_0 = arith.constant 0 : i32
    return %c0_i32, %arg1 : i32, i32
  }
  func.func @transform_3(%arg0: i32, %arg1: i32) -> (i32, i32) {
    %c0_i32 = arith.constant 0 : i32
    return %arg0, %arg1 : i32, i32
  }
}

module attributes {stable_mosaic.version = 11 : i64} {
  func.func @_dropout_linear_kernel(%arg0: i32, %arg1: i32, %arg2: memref<200x96xf32, #tpu.memory_space<vmem>>, %arg3: memref<96x128xf32, #tpu.memory_space<vmem>>, %arg4: memref<1x128xf32, #tpu.memory_space<vmem>>, %arg5: memref<200x128xf32, #tpu.memory_space<vmem>>) attributes {dimension_semantics = [#tpu.dimension_semantics<parallel>, #tpu.dimension_semantics<parallel>], iteration_bounds = array<i64: 1, 1>, scalar_prefetch = 0 : i64, scratch_operands = 0 : i64, tpu.core_type = #tpu.core_type<tc>, window_params = [{transform_indices = @transform_0, window_bounds = array<i64: 200, 96>}, {transform_indices = @transform_1, window_bounds = array<i64: 96, 128>}, {transform_indices = @transform_2, window_bounds = array<i64: 1, 128>}, {transform_indices = @transform_3, window_bounds = array<i64: 200, 128>}]} {
    %c0 = arith.constant 0 : index
    %c0_0 = arith.constant 0 : index
    %0 = vector.load %arg2[%c0, %c0_0] : memref<200x96xf32, #tpu.memory_space<vmem>>, vector<200x96xf32>
    %c0_1 = arith.constant 0 : index
    %c0_2 = arith.constant 0 : index
    %1 = vector.load %arg3[%c0_1, %c0_2] : memref<96x128xf32, #tpu.memory_space<vmem>>, vector<96x128xf32>
    %cst = arith.constant dense<0.000000e+00> : vector<200x128xf32>
    %2 = tpu.matmul %0, %1, %cst {dimension_numbers = #tpu.dot_dimension_numbers<[1], [0], [0], [1], [0, 0, 1, 1], [], []>} : vector<200x96xf32>, vector<96x128xf32>, vector<200x128xf32> -> vector<200x128xf32>
    %c0_3 = arith.constant 0 : index
    %c0_4 = arith.constant 0 : index
    %3 = vector.load %arg4[%c0_3, %c0_4] : memref<1x128xf32, #tpu.memory_space<vmem>>, vector<1x128xf32>
    %4 = vector.broadcast %3 : vector<1x128xf32> to vector<200x128xf32>
    %5 = arith.addf %2, %4 : vector<200x128xf32>
    %c0_5 = arith.constant 0 : index
    %c0_6 = arith.constant 0 : index
    %6 = vector.load %arg5[%c0_5, %c0_6] : memref<200x128xf32, #tpu.memory_space<vmem>>, vector<200x128xf32>
    tpu.vector_store %arg5[%c0_5, %c0_6], %5 {strides = array<i32>} : memref<200x128xf32, #tpu.memory_space<vmem>>, vector<200x128xf32>,
    return
  }
  func.func @transform_0(%arg0: i32, %arg1: i32) -> (i32, i32) {
    %c0_i32 = arith.constant 0 : i32
    %c0_i32_0 = arith.constant 0 : i32
    return %arg0, %c0_i32 : i32, i32
  }
  func.func @transform_1(%arg0: i32, %arg1: i32) -> (i32, i32) {
    %c0_i32 = arith.constant 0 : i32
    %c0_i32_0 = arith.constant 0 : i32
    return %c0_i32, %arg1 : i32, i32
  }
  func.func @transform_2(%arg0: i32, %arg1: i32) -> (i32, i32) {
    %c0_i32 = arith.constant 0 : i32
    %c0_i32_0 = arith.constant 0 : i32
    return %c0_i32, %arg1 : i32, i32
  }
  func.func @transform_3(%arg0: i32, %arg1: i32) -> (i32, i32) {
    %c0_i32 = arith.constant 0 : i32
    return %arg0, %arg1 : i32, i32
  }
}

</mosaic_0001>

<bundles_post_ra>
// kernel: tpu_custom_call.1
= control target key start
LH: loop header
LB: loop body
LE: loop exit
PB: predicated region body
PF: predicated region fallthrough
CT: control target
= control target key end

     0   :  { %v588_v3 = vmov 0.0|0.0   ;;  %vm589_vm0 = vmmov 0   ;;  %v590_v6 = vmov 0.0   ;;  %s842_s0 = inlined_call_operand.vmem [shape: f32[200,96], index: 0, kind: input, shape index: {}]   ;;  %s843_s1 = inlined_call_operand.vmem [shape: f32[96,128], index: 1, kind: input, shape index: {}]   ;;  %s844_s2 = inlined_call_operand.vmem [shape: f32[1,128], index: 2, kind: input, shape index: {}]   ;;  %s845_s3 = inlined_call_operand.hbm [shape: f32[200,128], index: 3, kind: output, shape index: {}]  }
   0x1   :  { %v40_v0 = vld [vmem:[%s843_s1] sm:$0xff]  ;;  %v41_v1 = vld [vmem:[%s843_s1 + $0x8] sm:$0xff]  ;;  %v42_v2 = vld [vmem:[%s843_s1 + $0x10] sm:$0xff]  ;;  %528 = vmatprep.subr.bf16.mxu0 %v588_v3  ;;  %546 = vmatprep.subr.bf16.mxu1 %v588_v3 }
   0x2   :  { %v529_v4 = vpack.c.bf16 %v41_v1, %v40_v0  ;;  %v43_v5 = vld [vmem:[%s843_s1 + $0x18] sm:$0xff]  ;;  %453 = vmatprep.mubr.msk.f32.mxu0 %vm589_vm0, %v590_v6  ;;  %492 = vmatprep.mubr.msk.f32.mxu1 %vm589_vm0, %v590_v6  ;;  %v44_v8 = vld [vmem:[%s843_s1 + $0x20] sm:$0xff]  ;;  %v45_v9 = vld [vmem:[%s843_s1 + $0x28] sm:$0xff] }
   0x3   :  { %v532_v7 = vpack.c.bf16 %v43_v5, %v42_v2  ;;  %v535_v10 = vpack.c.bf16 %v45_v9, %v44_v8  ;;  %v46_v11 = vld [vmem:[%s843_s1 + $0x30] sm:$0xff]  ;;  %v47_v12 = vld [vmem:[%s843_s1 + $0x38] sm:$0xff]  ;;  %v48_v14 = vld [vmem:[%s843_s1 + $0x40] sm:$0xff] }
   0x4   :  { %530 = vmatpush3.bf16.msra.mxu0 %v529_v4  ;;  %552 = vmatpush3.bf16.msra.mxu1 %v529_v4  ;;  %v538_v13 = vpack.c.bf16 %v47_v12, %v46_v11  ;;  %v49_v15 = vld [vmem:[%s843_s1 + $0x48] sm:$0xff] }
   0x5   :  { %531 = vmatprep.subr.bf16.mxu0 %v588_v3  ;;  %547 = vmatprep.subr.bf16.mxu1 %v588_v3 }
   0x8   :  { %533 = vmatpush3.bf16.msra.mxu0 %v532_v7  ;;  %553 = vmatpush3.bf16.msra.mxu1 %v532_v7 }
   0x9   :  { %534 = vmatprep.subr.bf16.mxu0 %v588_v3  ;;  %548 = vmatprep.subr.bf16.mxu1 %v588_v3 }
   0xc   :  { %536 = vmatpush3.bf16.msra.mxu0 %v535_v10  ;;  %554 = vmatpush3.bf16.msra.mxu1 %v535_v10 }
   0xd   :  { %537 = vmatprep.subr.bf16.mxu0 %v588_v3  ;;  %549 = vmatprep.subr.bf16.mxu1 %v588_v3 }
   0xe   :  { %8 = vsyncpa [#allocation3], 0  ;;  %v541_v16 = vpack.c.bf16 %v49_v15, %v48_v14  ;;  %v50_v17 = vld [vmem:[%s843_s1 + $0x50] sm:$0xff]  ;;  %v51_v18 = vld [vmem:[%s843_s1 + $0x58] sm:$0xff]  ;;  %vm59_vm1 = vcmask 785408  }
   0xf   :  { %v544_v19 = vpack.c.bf16 %v51_v18, %v50_v17  ;;  %v15_v20 = vld [vmem:[%s842_s0] sm:$0xff]  ;;  %v28_v21 = vld [vmem:[%s842_s0 + $0x68] sm:$0xff]  ;;  %v29_v23 = vld [vmem:[%s842_s0 + $0x70] sm:$0xff] }
  0x10   :  { %539 = vmatpush3.bf16.msra.mxu0 %v538_v13  ;;  %555 = vmatpush3.bf16.msra.mxu1 %v538_v13  ;;  %v16_v22 = vld [vmem:[%s842_s0 + $0x8] sm:$0xff]  ;;  %v17_v24 = vld [vmem:[%s842_s0 + $0x10] sm:$0xff]  ;;  %v30_v25 = vld [vmem:[%s842_s0 + $0x78] sm:$0xff] }
  0x11   :  { %540 = vmatprep.subr.bf16.mxu0 %v588_v3  ;;  %550 = vmatprep.subr.bf16.mxu1 %v588_v3  ;;  %v18_v26 = vld [vmem:[%s842_s0 + $0x18] sm:$0xff]  ;;  %v31_v27 = vld [vmem:[%s842_s0 + $0x80] sm:$0xff]  ;;  %v32_v29 = vld [vmem:[%s842_s0 + $0x88] sm:$0xff] }
  0x12   :  { %v19_v28 = vld [vmem:[%s842_s0 + $0x20] sm:$0xff]  ;;  %v20_v30 = vld [vmem:[%s842_s0 + $0x28] sm:$0xff]  ;;  %v33_v31 = vld [vmem:[%s842_s0 + $0x90] sm:$0xff] }
  0x13   :  { %v21_v32 = vld [vmem:[%s842_s0 + $0x30] sm:$0xff]  ;;  %v34_v33 = vld [vmem:[%s842_s0 + $0x98] sm:$0xff]  ;;  %v35_v35 = vld [vmem:[%s842_s0 + $0xa0] sm:$0xff] }
  0x14   :  { %542 = vmatpush3.bf16.msra.mxu0 %v541_v16  ;;  %556 = vmatpush3.bf16.msra.mxu1 %v541_v16  ;;  %v22_v34 = vld [vmem:[%s842_s0 + $0x38] sm:$0xff]  ;;  %v23_v36 = vld [vmem:[%s842_s0 + $0x40] sm:$0xff]  ;;  %v36_v37 = vld [vmem:[%s842_s0 + $0xa8] sm:$0xff] }
  0x15   :  { %543 = vmatprep.subr.bf16.mxu0 %v588_v3  ;;  %551 = vmatprep.subr.bf16.mxu1 %v588_v3  ;;  %v24_v38 = vld [vmem:[%s842_s0 + $0x48] sm:$0xff]  ;;  %v37_v39 = vld [vmem:[%s842_s0 + $0xb0] sm:$0xff]  ;;  %v38_v41 = vld [vmem:[%s842_s0 + $0xb8] sm:$0xff] }
  0x16   :  { %v25_v40 = vld [vmem:[%s842_s0 + $0x50] sm:$0xff]  ;;  %v26_v42 = vld [vmem:[%s842_s0 + $0x58] sm:$0xff]  ;;  %v39_v43 = vld [vmem:[%s842_s0 + $0xc0] sm:$0xff] }
  0x17   :  { %v27_v44 = vld [vmem:[%s842_s0 + $0x60] sm:$0xff]  ;;  %s591_s0 = smov [#allocation2]  }
  0x18   :  { %545 = vmatpush3.bf16.msra.mxu0 %v544_v19  ;;  %557 = vmatpush3.bf16.msra.mxu1 %v544_v19  ;;  %v803_v45 = vld [vmem:[%s844_s2] ss:$0 sm:$0xff]  ;;  %s355_s2 = sshll.u32 %s591_s0, 4  ;;  %s356_s2 = int_to_ptr.vmem [resolvable:$true] %s355_s2 }
  0x19   :  { %s564_s5 = scalar_lea.vmem %s356_s2, 3200  ;;  %p569_p1 = scmp.lt.s32.totalorder %s356_s2, %s356_s2 }
  0x1a   :  { %p565_p0 = scmp.ne.s32.totalorder %s356_s2, %s564_s5  ;;  %p570_p2 = scmp.lt.s32.totalorder %s564_s5, %s564_s5 }
  0x1b   :  { %454 = vmatmul.mubr.msk.f32.vlgmr.msra.gmra.mrb[0].mxu0 %vm59_vm1, %v15_v20  ;;  %493 = vmatmul.mubr.msk.f32.vlgmr.msra.gmra.mrb[0].mxu1 %vm59_vm1, %v28_v21 }
  0x1c   :  { %456 = vmatprep.mubr.msk.f32.mxu0 %vm589_vm0, %v590_v6  ;;  %495 = vmatprep.mubr.msk.f32.mxu1 %vm589_vm0, %v590_v6  ;;  %p571_p3 = por %p570_p2, %p569_p1 }
  0x1e   :  { %p572_p4 = pnand %p571_p3, %p565_p0 }
  0x1f   :  { %457 = vmatmul.mubr.msk.f32.gmra.mrb[2].mxu0 %vm59_vm1, %v16_v22  ;;  %496 = vmatmul.mubr.msk.f32.gmra.mrb[2].mxu1 %vm59_vm1, %v29_v23 }
  0x20   :  { %459 = vmatprep.mubr.msk.f32.mxu0 %vm589_vm0, %v590_v6  ;;  %498 = vmatprep.mubr.msk.f32.mxu1 %vm589_vm0, %v590_v6 }
  0x23   :  { %460 = vmatmul.mubr.msk.f32.gmra.mrb[4].mxu0 %vm59_vm1, %v17_v24  ;;  %499 = vmatmul.mubr.msk.f32.gmra.mrb[4].mxu1 %vm59_vm1, %v30_v25 }
  0x24   :  { %462 = vmatprep.mubr.msk.f32.mxu0 %vm589_vm0, %v590_v6  ;;  %501 = vmatprep.mubr.msk.f32.mxu1 %vm589_vm0, %v590_v6 }
  0x27   :  { %463 = vmatmul.mubr.msk.f32.gmra.mrb[6].mxu0 %vm59_vm1, %v18_v26  ;;  %502 = vmatmul.mubr.msk.f32.gmra.mrb[6].mxu1 %vm59_vm1, %v31_v27 }
  0x28   :  { %465 = vmatprep.mubr.msk.f32.mxu0 %vm589_vm0, %v590_v6  ;;  %504 = vmatprep.mubr.msk.f32.mxu1 %vm589_vm0, %v590_v6 }
  0x2b   :  { %466 = vmatmul.mubr.msk.f32.gmra.mrb[8].mxu0 %vm59_vm1, %v19_v28  ;;  %505 = vmatmul.mubr.msk.f32.gmra.mrb[8].mxu1 %vm59_vm1, %v32_v29 }
  0x2c   :  { %468 = vmatprep.mubr.msk.f32.mxu0 %vm589_vm0, %v590_v6  ;;  %507 = vmatprep.mubr.msk.f32.mxu1 %vm589_vm0, %v590_v6 }
  0x2f   :  { %469 = vmatmul.mubr.msk.f32.gmra.mrb[10].mxu0 %vm59_vm1, %v20_v30  ;;  %508 = vmatmul.mubr.msk.f32.gmra.mrb[10].mxu1 %vm59_vm1, %v33_v31 }
  0x30   :  { %471 = vmatprep.mubr.msk.f32.mxu0 %vm589_vm0, %v590_v6  ;;  %510 = vmatprep.mubr.msk.f32.mxu1 %vm589_vm0, %v590_v6 }
  0x33   :  { %472 = vmatmul.mubr.msk.f32.gmra.mrb[12].mxu0 %vm59_vm1, %v21_v32  ;;  %511 = vmatmul.mubr.msk.f32.gmra.mrb[12].mxu1 %vm59_vm1, %v34_v33 }
  0x34   :  { %474 = vmatprep.mubr.msk.f32.mxu0 %vm589_vm0, %v590_v6  ;;  %513 = vmatprep.mubr.msk.f32.mxu1 %vm589_vm0, %v590_v6 }
  0x37   :  { %475 = vmatmul.mubr.msk.f32.gmra.mrb[14].mxu0 %vm59_vm1, %v22_v34  ;;  %514 = vmatmul.mubr.msk.f32.gmra.mrb[14].mxu1 %vm59_vm1, %v35_v35 }
  0x38   :  { %477 = vmatprep.mubr.msk.f32.mxu0 %vm589_vm0, %v590_v6  ;;  %516 = vmatprep.mubr.msk.f32.mxu1 %vm589_vm0, %v590_v6 }
  0x3b   :  { %478 = vmatmul.mubr.msk.f32.gmra.mrb[16].mxu0 %vm59_vm1, %v23_v36  ;;  %517 = vmatmul.mubr.msk.f32.gmra.mrb[16].mxu1 %vm59_vm1, %v36_v37 }
  0x3c   :  { %480 = vmatprep.mubr.msk.f32.mxu0 %vm589_vm0, %v590_v6  ;;  %519 = vmatprep.mubr.msk.f32.mxu1 %vm589_vm0, %v590_v6 }
  0x3f   :  { %481 = vmatmul.mubr.msk.f32.gmra.mrb[18].mxu0 %vm59_vm1, %v24_v38  ;;  %520 = vmatmul.mubr.msk.f32.gmra.mrb[18].mxu1 %vm59_vm1, %v37_v39 }
  0x40   :  { %483 = vmatprep.mubr.msk.f32.mxu0 %vm589_vm0, %v590_v6  ;;  %522 = vmatprep.mubr.msk.f32.mxu1 %vm589_vm0, %v590_v6 }
  0x43   :  { %484 = vmatmul.mubr.msk.f32.gmra.mrb[20].mxu0 %vm59_vm1, %v25_v40  ;;  %523 = vmatmul.mubr.msk.f32.gmra.mrb[20].mxu1 %vm59_vm1, %v38_v41 }
  0x44   :  { %486 = vmatprep.mubr.msk.f32.mxu0 %vm589_vm0, %v590_v6  ;;  %525 = vmatprep.mubr.msk.f32.mxu1 %vm589_vm0, %v590_v6 }
  0x47   :  { %487 = vmatmul.mubr.msk.f32.gmra.mrb[22].mxu0 %vm59_vm1, %v26_v42  ;;  %526 = vmatmul.mubr.msk.f32.gmra.mrb[22].mxu1 %vm59_vm1, %v39_v43 }
  0x48   :  { %489 = vmatprep.mubr.msk.f32.mxu0 %vm589_vm0, %v590_v6 }
  0x4b   :  { %490 = vmatmul.mubr.msk.f32.gmra.mrb[24].mxu0 %vm59_vm1, %v27_v44 }
  0xee   :  { %v201_v46 = vpop.f32.mrb[0].mxu0  ;;  %v266_v47 = vpop.f32.mrb[0].mxu1 }
  0xef   :  { %v202_v48 = vadd.f32 %v803_v45, %v201_v46  ;;  %v455_v49 = vpop.f32.mrb[1].mxu0  ;;  %v267_v50 = vadd.f32 %v803_v45, %v266_v47  ;;  %v494_v51 = vpop.f32.mrb[1].mxu1 }
  0xf1   :  { %325 = vst [vmem:[#allocation2] sm:$0xff] %v202_v48  ;;  %338 = vst [vmem:[#allocation2 + $0x68] sm:$0xff] %v267_v50 }
  0xf2   :  { %v206_v52 = vpop.f32.mrb[2].mxu0  ;;  %v271_v53 = vpop.f32.mrb[2].mxu1 }
  0xf3   :  { %v207_v54 = vadd.f32 %v803_v45, %v206_v52  ;;  %v458_v55 = vpop.f32.mrb[3].mxu0  ;;  %v272_v56 = vadd.f32 %v803_v45, %v271_v53  ;;  %v497_v57 = vpop.f32.mrb[3].mxu1 }
  0xf5   :  { %326 = vst [vmem:[#allocation2 + $0x8] sm:$0xff] %v207_v54  ;;  %339 = vst [vmem:[#allocation2 + $0x70] sm:$0xff] %v272_v56 }
  0xf6   :  { %v211_v58 = vpop.f32.mrb[4].mxu0  ;;  %v276_v59 = vpop.f32.mrb[4].mxu1 }
  0xf7   :  { %v212_v60 = vadd.f32 %v803_v45, %v211_v58  ;;  %v461_v61 = vpop.f32.mrb[5].mxu0  ;;  %v277_v62 = vadd.f32 %v803_v45, %v276_v59  ;;  %v500_v63 = vpop.f32.mrb[5].mxu1 }
  0xf9   :  { %327 = vst [vmem:[#allocation2 + $0x10] sm:$0xff] %v212_v60  ;;  %340 = vst [vmem:[#allocation2 + $0x78] sm:$0xff] %v277_v62 }
  0xfa   :  { %v216_v0 = vpop.f32.mrb[6].mxu0  ;;  %v281_v1 = vpop.f32.mrb[6].mxu1 }
  0xfb   :  { %v217_v2 = vadd.f32 %v803_v45, %v216_v0  ;;  %v464_v3 = vpop.f32.mrb[7].mxu0  ;;  %v282_v4 = vadd.f32 %v803_v45, %v281_v1  ;;  %v503_v5 = vpop.f32.mrb[7].mxu1 }
  0xfd   :  { %328 = vst [vmem:[#allocation2 + $0x18] sm:$0xff] %v217_v2  ;;  %341 = vst [vmem:[#allocation2 + $0x80] sm:$0xff] %v282_v4 }
  0xfe   :  { %v221_v6 = vpop.f32.mrb[8].mxu0  ;;  %v286_v7 = vpop.f32.mrb[8].mxu1 }
  0xff   :  { %v222_v8 = vadd.f32 %v803_v45, %v221_v6  ;;  %v467_v9 = vpop.f32.mrb[9].mxu0  ;;  %v287_v10 = vadd.f32 %v803_v45, %v286_v7  ;;  %v506_v11 = vpop.f32.mrb[9].mxu1 }
 0x101   :  { %329 = vst [vmem:[#allocation2 + $0x20] sm:$0xff] %v222_v8  ;;  %342 = vst [vmem:[#allocation2 + $0x88] sm:$0xff] %v287_v10 }
 0x102   :  { %v226_v12 = vpop.f32.mrb[10].mxu0  ;;  %v291_v13 = vpop.f32.mrb[10].mxu1 }
 0x103   :  { %v227_v14 = vadd.f32 %v803_v45, %v226_v12  ;;  %v470_v15 = vpop.f32.mrb[11].mxu0  ;;  %v292_v16 = vadd.f32 %v803_v45, %v291_v13  ;;  %v509_v17 = vpop.f32.mrb[11].mxu1 }
 0x105   :  { %330 = vst [vmem:[#allocation2 + $0x28] sm:$0xff] %v227_v14  ;;  %343 = vst [vmem:[#allocation2 + $0x90] sm:$0xff] %v292_v16 }
 0x106   :  { %v231_v18 = vpop.f32.mrb[12].mxu0  ;;  %v296_v19 = vpop.f32.mrb[12].mxu1 }
 0x107   :  { %v232_v20 = vadd.f32 %v803_v45, %v231_v18  ;;  %v473_v21 = vpop.f32.mrb[13].mxu0  ;;  %v297_v22 = vadd.f32 %v803_v45, %v296_v19  ;;  %v512_v23 = vpop.f32.mrb[13].mxu1 }
 0x109   :  { %331 = vst [vmem:[#allocation2 + $0x30] sm:$0xff] %v232_v20  ;;  %344 = vst [vmem:[#allocation2 + $0x98] sm:$0xff] %v297_v22 }
 0x10a   :  { %v236_v24 = vpop.f32.mrb[14].mxu0  ;;  %v301_v25 = vpop.f32.mrb[14].mxu1 }
 0x10b   :  { %v237_v26 = vadd.f32 %v803_v45, %v236_v24  ;;  %v476_v27 = vpop.f32.mrb[15].mxu0  ;;  %v302_v28 = vadd.f32 %v803_v45, %v301_v25  ;;  %v515_v29 = vpop.f32.mrb[15].mxu1 }
 0x10d   :  { %332 = vst [vmem:[#allocation2 + $0x38] sm:$0xff] %v237_v26  ;;  %345 = vst [vmem:[#allocation2 + $0xa0] sm:$0xff] %v302_v28 }
 0x10e   :  { %v241_v30 = vpop.f32.mrb[16].mxu0  ;;  %v306_v31 = vpop.f32.mrb[16].mxu1 }
 0x10f   :  { %v242_v32 = vadd.f32 %v803_v45, %v241_v30  ;;  %v479_v33 = vpop.f32.mrb[17].mxu0  ;;  %v307_v34 = vadd.f32 %v803_v45, %v306_v31  ;;  %v518_v35 = vpop.f32.mrb[17].mxu1 }
 0x111   :  { %333 = vst [vmem:[#allocation2 + $0x40] sm:$0xff] %v242_v32  ;;  %346 = vst [vmem:[#allocation2 + $0xa8] sm:$0xff] %v307_v34 }
 0x112   :  { %v246_v36 = vpop.f32.mrb[18].mxu0  ;;  %v311_v37 = vpop.f32.mrb[18].mxu1 }
 0x113   :  { %v247_v38 = vadd.f32 %v803_v45, %v246_v36  ;;  %v482_v39 = vpop.f32.mrb[19].mxu0  ;;  %v312_v40 = vadd.f32 %v803_v45, %v311_v37  ;;  %v521_v41 = vpop.f32.mrb[19].mxu1 }
 0x115   :  { %334 = vst [vmem:[#allocation2 + $0x48] sm:$0xff] %v247_v38  ;;  %347 = vst [vmem:[#allocation2 + $0xb0] sm:$0xff] %v312_v40 }
 0x116   :  { %v251_v42 = vpop.f32.mrb[20].mxu0  ;;  %v316_v43 = vpop.f32.mrb[20].mxu1 }
 0x117   :  { %v252_v44 = vadd.f32 %v803_v45, %v251_v42  ;;  %v485_v46 = vpop.f32.mrb[21].mxu0  ;;  %v317_v47 = vadd.f32 %v803_v45, %v316_v43  ;;  %v524_v48 = vpop.f32.mrb[21].mxu1 }
 0x119   :  { %335 = vst [vmem:[#allocation2 + $0x50] sm:$0xff] %v252_v44  ;;  %348 = vst [vmem:[#allocation2 + $0xb8] sm:$0xff] %v317_v47 }
 0x11a   :  { %v256_v49 = vpop.f32.mrb[22].mxu0  ;;  %v321_v50 = vpop.f32.mrb[22].mxu1 }
 0x11b   :  { %v257_v51 = vadd.f32 %v803_v45, %v256_v49  ;;  %v488_v52 = vpop.f32.mrb[23].mxu0  ;;  %v322_v53 = vadd.f32 %v803_v45, %v321_v50  ;;  %v527_v54 = vpop.f32.mrb[23].mxu1 }
 0x11d   :  { %336 = vst [vmem:[#allocation2 + $0x58] sm:$0xff] %v257_v51  ;;  %349 = vst [vmem:[#allocation2 + $0xc0] sm:$0xff] %v322_v53 }
 0x11e   :  { %v261_v55 = vpop.f32.mrb[24].mxu0 }
 0x11f   :  { %v262_v56 = vadd.f32 %v803_v45, %v261_v55  ;;  %v491_v57 = vpop.f32.mrb[25].mxu0 }
 0x121   :  { %337 = vst [vmem:[#allocation2 + $0x60] sm:$0xff] %v262_v56 }
 0x122   :  { %575 = shalt.err (!%p572_p4)
}
 0x123   :  { %s576_s8 = scalar_lea.hbm %s845_s3, 3200 }
 0x124   :  { %p577_p5 = scmp.ne.s32.totalorder %s845_s3, %s576_s8  ;;  %p580_p6 = scmp.lt.u32.totalorder %s576_s8, %s845_s3 }
 0x126   :  { %p582_p7 = pnand %p580_p6, %p577_p5 }
 0x128   :  { %585 = shalt.err (!%p582_p7)
}
 0x129   :  { %s592_s1 = smov 128   ;;  %s593_s13 = smov 8  }
 0x12a   :  { %361 = dma.vmem_to_hbm [thread:$0]  %s356_s2, 3200, %s845_s3, [#allocation3], %s592_s1, %s592_s1, %s593_s13  }
 0x12b   :  { %586 = dma.done.wait [#allocation3], 3200  }
 0x12c   :  { %587 = vsyncadd [#allocation3], 4294964096 }
 0x12d   :  { %365 = vsyncpa [#allocation3], 1 }

// kernel: tpu_custom_call.1
= control target key start
LH: loop header
LB: loop body
LE: loop exit
PB: predicated region body
PF: predicated region fallthrough
CT: control target
= control target key end

     0   :  { %v588_v3 = vmov 0.0|0.0   ;;  %vm589_vm0 = vmmov 0   ;;  %v590_v6 = vmov 0.0   ;;  %s842_s0 = inlined_call_operand.vmem [shape: f32[200,96], index: 0, kind: input, shape index: {}]   ;;  %s843_s1 = inlined_call_operand.vmem [shape: f32[96,128], index: 1, kind: input, shape index: {}]   ;;  %s844_s2 = inlined_call_operand.vmem [shape: f32[1,128], index: 2, kind: input, shape index: {}]   ;;  %s845_s3 = inlined_call_operand.hbm [shape: f32[200,128], index: 3, kind: output, shape index: {}]  }
   0x1   :  { %v40_v0 = vld [vmem:[%s843_s1] sm:$0xff]  ;;  %v41_v1 = vld [vmem:[%s843_s1 + $0x8] sm:$0xff]  ;;  %v42_v2 = vld [vmem:[%s843_s1 + $0x10] sm:$0xff]  ;;  %528 = vmatprep.subr.bf16.mxu0 %v588_v3  ;;  %546 = vmatprep.subr.bf16.mxu1 %v588_v3 }
   0x2   :  { %v529_v4 = vpack.c.bf16 %v41_v1, %v40_v0  ;;  %v43_v5 = vld [vmem:[%s843_s1 + $0x18] sm:$0xff]  ;;  %453 = vmatprep.mubr.msk.f32.mxu0 %vm589_vm0, %v590_v6  ;;  %492 = vmatprep.mubr.msk.f32.mxu1 %vm589_vm0, %v590_v6  ;;  %v44_v8 = vld [vmem:[%s843_s1 + $0x20] sm:$0xff]  ;;  %v45_v9 = vld [vmem:[%s843_s1 + $0x28] sm:$0xff] }
   0x3   :  { %v532_v7 = vpack.c.bf16 %v43_v5, %v42_v2  ;;  %v535_v10 = vpack.c.bf16 %v45_v9, %v44_v8  ;;  %v46_v11 = vld [vmem:[%s843_s1 + $0x30] sm:$0xff]  ;;  %v47_v12 = vld [vmem:[%s843_s1 + $0x38] sm:$0xff]  ;;  %v48_v14 = vld [vmem:[%s843_s1 + $0x40] sm:$0xff] }
   0x4   :  { %530 = vmatpush3.bf16.msra.mxu0 %v529_v4  ;;  %552 = vmatpush3.bf16.msra.mxu1 %v529_v4  ;;  %v538_v13 = vpack.c.bf16 %v47_v12, %v46_v11  ;;  %v49_v15 = vld [vmem:[%s843_s1 + $0x48] sm:$0xff] }
   0x5   :  { %531 = vmatprep.subr.bf16.mxu0 %v588_v3  ;;  %547 = vmatprep.subr.bf16.mxu1 %v588_v3 }
   0x8   :  { %533 = vmatpush3.bf16.msra.mxu0 %v532_v7  ;;  %553 = vmatpush3.bf16.msra.mxu1 %v532_v7 }
   0x9   :  { %534 = vmatprep.subr.bf16.mxu0 %v588_v3  ;;  %548 = vmatprep.subr.bf16.mxu1 %v588_v3 }
   0xc   :  { %536 = vmatpush3.bf16.msra.mxu0 %v535_v10  ;;  %554 = vmatpush3.bf16.msra.mxu1 %v535_v10 }
   0xd   :  { %537 = vmatprep.subr.bf16.mxu0 %v588_v3  ;;  %549 = vmatprep.subr.bf16.mxu1 %v588_v3 }
   0xe   :  { %8 = vsyncpa [#allocation3], 0  ;;  %v541_v16 = vpack.c.bf16 %v49_v15, %v48_v14  ;;  %v50_v17 = vld [vmem:[%s843_s1 + $0x50] sm:$0xff]  ;;  %v51_v18 = vld [vmem:[%s843_s1 + $0x58] sm:$0xff]  ;;  %vm59_vm1 = vcmask 785408  }
   0xf   :  { %v544_v19 = vpack.c.bf16 %v51_v18, %v50_v17  ;;  %v15_v20 = vld [vmem:[%s842_s0] sm:$0xff]  ;;  %v28_v21 = vld [vmem:[%s842_s0 + $0x68] sm:$0xff]  ;;  %v29_v23 = vld [vmem:[%s842_s0 + $0x70] sm:$0xff] }
  0x10   :  { %539 = vmatpush3.bf16.msra.mxu0 %v538_v13  ;;  %555 = vmatpush3.bf16.msra.mxu1 %v538_v13  ;;  %v16_v22 = vld [vmem:[%s842_s0 + $0x8] sm:$0xff]  ;;  %v17_v24 = vld [vmem:[%s842_s0 + $0x10] sm:$0xff]  ;;  %v30_v25 = vld [vmem:[%s842_s0 + $0x78] sm:$0xff] }
  0x11   :  { %540 = vmatprep.subr.bf16.mxu0 %v588_v3  ;;  %550 = vmatprep.subr.bf16.mxu1 %v588_v3  ;;  %v18_v26 = vld [vmem:[%s842_s0 + $0x18] sm:$0xff]  ;;  %v31_v27 = vld [vmem:[%s842_s0 + $0x80] sm:$0xff]  ;;  %v32_v29 = vld [vmem:[%s842_s0 + $0x88] sm:$0xff] }
  0x12   :  { %v19_v28 = vld [vmem:[%s842_s0 + $0x20] sm:$0xff]  ;;  %v20_v30 = vld [vmem:[%s842_s0 + $0x28] sm:$0xff]  ;;  %v33_v31 = vld [vmem:[%s842_s0 + $0x90] sm:$0xff] }
  0x13   :  { %v21_v32 = vld [vmem:[%s842_s0 + $0x30] sm:$0xff]  ;;  %v34_v33 = vld [vmem:[%s842_s0 + $0x98] sm:$0xff]  ;;  %v35_v35 = vld [vmem:[%s842_s0 + $0xa0] sm:$0xff] }
  0x14   :  { %542 = vmatpush3.bf16.msra.mxu0 %v541_v16  ;;  %556 = vmatpush3.bf16.msra.mxu1 %v541_v16  ;;  %v22_v34 = vld [vmem:[%s842_s0 + $0x38] sm:$0xff]  ;;  %v23_v36 = vld [vmem:[%s842_s0 + $0x40] sm:$0xff]  ;;  %v36_v37 = vld [vmem:[%s842_s0 + $0xa8] sm:$0xff] }
  0x15   :  { %543 = vmatprep.subr.bf16.mxu0 %v588_v3  ;;  %551 = vmatprep.subr.bf16.mxu1 %v588_v3  ;;  %v24_v38 = vld [vmem:[%s842_s0 + $0x48] sm:$0xff]  ;;  %v37_v39 = vld [vmem:[%s842_s0 + $0xb0] sm:$0xff]  ;;  %v38_v41 = vld [vmem:[%s842_s0 + $0xb8] sm:$0xff] }
  0x16   :  { %v25_v40 = vld [vmem:[%s842_s0 + $0x50] sm:$0xff]  ;;  %v26_v42 = vld [vmem:[%s842_s0 + $0x58] sm:$0xff]  ;;  %v39_v43 = vld [vmem:[%s842_s0 + $0xc0] sm:$0xff] }
  0x17   :  { %v27_v44 = vld [vmem:[%s842_s0 + $0x60] sm:$0xff]  ;;  %s591_s0 = smov [#allocation2]  }
  0x18   :  { %545 = vmatpush3.bf16.msra.mxu0 %v544_v19  ;;  %557 = vmatpush3.bf16.msra.mxu1 %v544_v19  ;;  %v803_v45 = vld [vmem:[%s844_s2] ss:$0 sm:$0xff]  ;;  %s355_s2 = sshll.u32 %s591_s0, 4  ;;  %s356_s2 = int_to_ptr.vmem [resolvable:$true] %s355_s2 }
  0x19   :  { %s564_s5 = scalar_lea.vmem %s356_s2, 3200  ;;  %p569_p1 = scmp.lt.s32.totalorder %s356_s2, %s356_s2 }
  0x1a   :  { %p565_p0 = scmp.ne.s32.totalorder %s356_s2, %s564_s5  ;;  %p570_p2 = scmp.lt.s32.totalorder %s564_s5, %s564_s5 }
  0x1b   :  { %454 = vmatmul.mubr.msk.f32.vlgmr.msra.gmra.mrb[0].mxu0 %vm59_vm1, %v15_v20  ;;  %493 = vmatmul.mubr.msk.f32.vlgmr.msra.gmra.mrb[0].mxu1 %vm59_vm1, %v28_v21 }
  0x1c   :  { %456 = vmatprep.mubr.msk.f32.mxu0 %vm589_vm0, %v590_v6  ;;  %495 = vmatprep.mubr.msk.f32.mxu1 %vm589_vm0, %v590_v6  ;;  %p571_p3 = por %p570_p2, %p569_p1 }
  0x1e   :  { %p572_p4 = pnand %p571_p3, %p565_p0 }
  0x1f   :  { %457 = vmatmul.mubr.msk.f32.gmra.mrb[2].mxu0 %vm59_vm1, %v16_v22  ;;  %496 = vmatmul.mubr.msk.f32.gmra.mrb[2].mxu1 %vm59_vm1, %v29_v23 }
  0x20   :  { %459 = vmatprep.mubr.msk.f32.mxu0 %vm589_vm0, %v590_v6  ;;  %498 = vmatprep.mubr.msk.f32.mxu1 %vm589_vm0, %v590_v6 }
  0x23   :  { %460 = vmatmul.mubr.msk.f32.gmra.mrb[4].mxu0 %vm59_vm1, %v17_v24  ;;  %499 = vmatmul.mubr.msk.f32.gmra.mrb[4].mxu1 %vm59_vm1, %v30_v25 }
  0x24   :  { %462 = vmatprep.mubr.msk.f32.mxu0 %vm589_vm0, %v590_v6  ;;  %501 = vmatprep.mubr.msk.f32.mxu1 %vm589_vm0, %v590_v6 }
  0x27   :  { %463 = vmatmul.mubr.msk.f32.gmra.mrb[6].mxu0 %vm59_vm1, %v18_v26  ;;  %502 = vmatmul.mubr.msk.f32.gmra.mrb[6].mxu1 %vm59_vm1, %v31_v27 }
  0x28   :  { %465 = vmatprep.mubr.msk.f32.mxu0 %vm589_vm0, %v590_v6  ;;  %504 = vmatprep.mubr.msk.f32.mxu1 %vm589_vm0, %v590_v6 }
  0x2b   :  { %466 = vmatmul.mubr.msk.f32.gmra.mrb[8].mxu0 %vm59_vm1, %v19_v28  ;;  %505 = vmatmul.mubr.msk.f32.gmra.mrb[8].mxu1 %vm59_vm1, %v32_v29 }
  0x2c   :  { %468 = vmatprep.mubr.msk.f32.mxu0 %vm589_vm0, %v590_v6  ;;  %507 = vmatprep.mubr.msk.f32.mxu1 %vm589_vm0, %v590_v6 }
  0x2f   :  { %469 = vmatmul.mubr.msk.f32.gmra.mrb[10].mxu0 %vm59_vm1, %v20_v30  ;;  %508 = vmatmul.mubr.msk.f32.gmra.mrb[10].mxu1 %vm59_vm1, %v33_v31 }
  0x30   :  { %471 = vmatprep.mubr.msk.f32.mxu0 %vm589_vm0, %v590_v6  ;;  %510 = vmatprep.mubr.msk.f32.mxu1 %vm589_vm0, %v590_v6 }
  0x33   :  { %472 = vmatmul.mubr.msk.f32.gmra.mrb[12].mxu0 %vm59_vm1, %v21_v32  ;;  %511 = vmatmul.mubr.msk.f32.gmra.mrb[12].mxu1 %vm59_vm1, %v34_v33 }
  0x34   :  { %474 = vmatprep.mubr.msk.f32.mxu0 %vm589_vm0, %v590_v6  ;;  %513 = vmatprep.mubr.msk.f32.mxu1 %vm589_vm0, %v590_v6 }
  0x37   :  { %475 = vmatmul.mubr.msk.f32.gmra.mrb[14].mxu0 %vm59_vm1, %v22_v34  ;;  %514 = vmatmul.mubr.msk.f32.gmra.mrb[14].mxu1 %vm59_vm1, %v35_v35 }
  0x38   :  { %477 = vmatprep.mubr.msk.f32.mxu0 %vm589_vm0, %v590_v6  ;;  %516 = vmatprep.mubr.msk.f32.mxu1 %vm589_vm0, %v590_v6 }
  0x3b   :  { %478 = vmatmul.mubr.msk.f32.gmra.mrb[16].mxu0 %vm59_vm1, %v23_v36  ;;  %517 = vmatmul.mubr.msk.f32.gmra.mrb[16].mxu1 %vm59_vm1, %v36_v37 }
  0x3c   :  { %480 = vmatprep.mubr.msk.f32.mxu0 %vm589_vm0, %v590_v6  ;;  %519 = vmatprep.mubr.msk.f32.mxu1 %vm589_vm0, %v590_v6 }
  0x3f   :  { %481 = vmatmul.mubr.msk.f32.gmra.mrb[18].mxu0 %vm59_vm1, %v24_v38  ;;  %520 = vmatmul.mubr.msk.f32.gmra.mrb[18].mxu1 %vm59_vm1, %v37_v39 }
  0x40   :  { %483 = vmatprep.mubr.msk.f32.mxu0 %vm589_vm0, %v590_v6  ;;  %522 = vmatprep.mubr.msk.f32.mxu1 %vm589_vm0, %v590_v6 }
  0x43   :  { %484 = vmatmul.mubr.msk.f32.gmra.mrb[20].mxu0 %vm59_vm1, %v25_v40  ;;  %523 = vmatmul.mubr.msk.f32.gmra.mrb[20].mxu1 %vm59_vm1, %v38_v41 }
  0x44   :  { %486 = vmatprep.mubr.msk.f32.mxu0 %vm589_vm0, %v590_v6  ;;  %525 = vmatprep.mubr.msk.f32.mxu1 %vm589_vm0, %v590_v6 }
  0x47   :  { %487 = vmatmul.mubr.msk.f32.gmra.mrb[22].mxu0 %vm59_vm1, %v26_v42  ;;  %526 = vmatmul.mubr.msk.f32.gmra.mrb[22].mxu1 %vm59_vm1, %v39_v43 }
  0x48   :  { %489 = vmatprep.mubr.msk.f32.mxu0 %vm589_vm0, %v590_v6 }
  0x4b   :  { %490 = vmatmul.mubr.msk.f32.gmra.mrb[24].mxu0 %vm59_vm1, %v27_v44 }
  0xee   :  { %v201_v46 = vpop.f32.mrb[0].mxu0  ;;  %v266_v47 = vpop.f32.mrb[0].mxu1 }
  0xef   :  { %v202_v48 = vadd.f32 %v803_v45, %v201_v46  ;;  %v455_v49 = vpop.f32.mrb[1].mxu0  ;;  %v267_v50 = vadd.f32 %v803_v45, %v266_v47  ;;  %v494_v51 = vpop.f32.mrb[1].mxu1 }
  0xf1   :  { %325 = vst [vmem:[#allocation2] sm:$0xff] %v202_v48  ;;  %338 = vst [vmem:[#allocation2 + $0x68] sm:$0xff] %v267_v50 }
  0xf2   :  { %v206_v52 = vpop.f32.mrb[2].mxu0  ;;  %v271_v53 = vpop.f32.mrb[2].mxu1 }
  0xf3   :  { %v207_v54 = vadd.f32 %v803_v45, %v206_v52  ;;  %v458_v55 = vpop.f32.mrb[3].mxu0  ;;  %v272_v56 = vadd.f32 %v803_v45, %v271_v53  ;;  %v497_v57 = vpop.f32.mrb[3].mxu1 }
  0xf5   :  { %326 = vst [vmem:[#allocation2 + $0x8] sm:$0xff] %v207_v54  ;;  %339 = vst [vmem:[#allocation2 + $0x70] sm:$0xff] %v272_v56 }
  0xf6   :  { %v211_v58 = vpop.f32.mrb[4].mxu0  ;;  %v276_v59 = vpop.f32.mrb[4].mxu1 }
  0xf7   :  { %v212_v60 = vadd.f32 %v803_v45, %v211_v58  ;;  %v461_v61 = vpop.f32.mrb[5].mxu0  ;;  %v277_v62 = vadd.f32 %v803_v45, %v276_v59  ;;  %v500_v63 = vpop.f32.mrb[5].mxu1 }
  0xf9   :  { %327 = vst [vmem:[#allocation2 + $0x10] sm:$0xff] %v212_v60  ;;  %340 = vst [vmem:[#allocation2 + $0x78] sm:$0xff] %v277_v62 }
  0xfa   :  { %v216_v0 = vpop.f32.mrb[6].mxu0  ;;  %v281_v1 = vpop.f32.mrb[6].mxu1 }
  0xfb   :  { %v217_v2 = vadd.f32 %v803_v45, %v216_v0  ;;  %v464_v3 = vpop.f32.mrb[7].mxu0  ;;  %v282_v4 = vadd.f32 %v803_v45, %v281_v1  ;;  %v503_v5 = vpop.f32.mrb[7].mxu1 }
  0xfd   :  { %328 = vst [vmem:[#allocation2 + $0x18] sm:$0xff] %v217_v2  ;;  %341 = vst [vmem:[#allocation2 + $0x80] sm:$0xff] %v282_v4 }
  0xfe   :  { %v221_v6 = vpop.f32.mrb[8].mxu0  ;;  %v286_v7 = vpop.f32.mrb[8].mxu1 }
  0xff   :  { %v222_v8 = vadd.f32 %v803_v45, %v221_v6  ;;  %v467_v9 = vpop.f32.mrb[9].mxu0  ;;  %v287_v10 = vadd.f32 %v803_v45, %v286_v7  ;;  %v506_v11 = vpop.f32.mrb[9].mxu1 }
 0x101   :  { %329 = vst [vmem:[#allocation2 + $0x20] sm:$0xff] %v222_v8  ;;  %342 = vst [vmem:[#allocation2 + $0x88] sm:$0xff] %v287_v10 }
 0x102   :  { %v226_v12 = vpop.f32.mrb[10].mxu0  ;;  %v291_v13 = vpop.f32.mrb[10].mxu1 }
 0x103   :  { %v227_v14 = vadd.f32 %v803_v45, %v226_v12  ;;  %v470_v15 = vpop.f32.mrb[11].mxu0  ;;  %v292_v16 = vadd.f32 %v803_v45, %v291_v13  ;;  %v509_v17 = vpop.f32.mrb[11].mxu1 }
 0x105   :  { %330 = vst [vmem:[#allocation2 + $0x28] sm:$0xff] %v227_v14  ;;  %343 = vst [vmem:[#allocation2 + $0x90] sm:$0xff] %v292_v16 }
 0x106   :  { %v231_v18 = vpop.f32.mrb[12].mxu0  ;;  %v296_v19 = vpop.f32.mrb[12].mxu1 }
 0x107   :  { %v232_v20 = vadd.f32 %v803_v45, %v231_v18  ;;  %v473_v21 = vpop.f32.mrb[13].mxu0  ;;  %v297_v22 = vadd.f32 %v803_v45, %v296_v19  ;;  %v512_v23 = vpop.f32.mrb[13].mxu1 }
 0x109   :  { %331 = vst [vmem:[#allocation2 + $0x30] sm:$0xff] %v232_v20  ;;  %344 = vst [vmem:[#allocation2 + $0x98] sm:$0xff] %v297_v22 }
 0x10a   :  { %v236_v24 = vpop.f32.mrb[14].mxu0  ;;  %v301_v25 = vpop.f32.mrb[14].mxu1 }
 0x10b   :  { %v237_v26 = vadd.f32 %v803_v45, %v236_v24  ;;  %v476_v27 = vpop.f32.mrb[15].mxu0  ;;  %v302_v28 = vadd.f32 %v803_v45, %v301_v25  ;;  %v515_v29 = vpop.f32.mrb[15].mxu1 }
 0x10d   :  { %332 = vst [vmem:[#allocation2 + $0x38] sm:$0xff] %v237_v26  ;;  %345 = vst [vmem:[#allocation2 + $0xa0] sm:$0xff] %v302_v28 }
 0x10e   :  { %v241_v30 = vpop.f32.mrb[16].mxu0  ;;  %v306_v31 = vpop.f32.mrb[16].mxu1 }
 0x10f   :  { %v242_v32 = vadd.f32 %v803_v45, %v241_v30  ;;  %v479_v33 = vpop.f32.mrb[17].mxu0  ;;  %v307_v34 = vadd.f32 %v803_v45, %v306_v31  ;;  %v518_v35 = vpop.f32.mrb[17].mxu1 }
 0x111   :  { %333 = vst [vmem:[#allocation2 + $0x40] sm:$0xff] %v242_v32  ;;  %346 = vst [vmem:[#allocation2 + $0xa8] sm:$0xff] %v307_v34 }
 0x112   :  { %v246_v36 = vpop.f32.mrb[18].mxu0  ;;  %v311_v37 = vpop.f32.mrb[18].mxu1 }
 0x113   :  { %v247_v38 = vadd.f32 %v803_v45, %v246_v36  ;;  %v482_v39 = vpop.f32.mrb[19].mxu0  ;;  %v312_v40 = vadd.f32 %v803_v45, %v311_v37  ;;  %v521_v41 = vpop.f32.mrb[19].mxu1 }
 0x115   :  { %334 = vst [vmem:[#allocation2 + $0x48] sm:$0xff] %v247_v38  ;;  %347 = vst [vmem:[#allocation2 + $0xb0] sm:$0xff] %v312_v40 }
 0x116   :  { %v251_v42 = vpop.f32.mrb[20].mxu0  ;;  %v316_v43 = vpop.f32.mrb[20].mxu1 }
 0x117   :  { %v252_v44 = vadd.f32 %v803_v45, %v251_v42  ;;  %v485_v46 = vpop.f32.mrb[21].mxu0  ;;  %v317_v47 = vadd.f32 %v803_v45, %v316_v43  ;;  %v524_v48 = vpop.f32.mrb[21].mxu1 }
 0x119   :  { %335 = vst [vmem:[#allocation2 + $0x50] sm:$0xff] %v252_v44  ;;  %348 = vst [vmem:[#allocation2 + $0xb8] sm:$0xff] %v317_v47 }
 0x11a   :  { %v256_v49 = vpop.f32.mrb[22].mxu0  ;;  %v321_v50 = vpop.f32.mrb[22].mxu1 }
 0x11b   :  { %v257_v51 = vadd.f32 %v803_v45, %v256_v49  ;;  %v488_v52 = vpop.f32.mrb[23].mxu0  ;;  %v322_v53 = vadd.f32 %v803_v45, %v321_v50  ;;  %v527_v54 = vpop.f32.mrb[23].mxu1 }
 0x11d   :  { %336 = vst [vmem:[#allocation2 + $0x58] sm:$0xff] %v257_v51  ;;  %349 = vst [vmem:[#allocation2 + $0xc0] sm:$0xff] %v322_v53 }
 0x11e   :  { %v261_v55 = vpop.f32.mrb[24].mxu0 }
 0x11f   :  { %v262_v56 = vadd.f32 %v803_v45, %v261_v55  ;;  %v491_v57 = vpop.f32.mrb[25].mxu0 }
 0x121   :  { %337 = vst [vmem:[#allocation2 + $0x60] sm:$0xff] %v262_v56 }
 0x122   :  { %575 = shalt.err (!%p572_p4)
}
 0x123   :  { %s576_s8 = scalar_lea.hbm %s845_s3, 3200 }
 0x124   :  { %p577_p5 = scmp.ne.s32.totalorder %s845_s3, %s576_s8  ;;  %p580_p6 = scmp.lt.u32.totalorder %s576_s8, %s845_s3 }
 0x126   :  { %p582_p7 = pnand %p580_p6, %p577_p5 }
 0x128   :  { %585 = shalt.err (!%p582_p7)
}
 0x129   :  { %s592_s1 = smov 128   ;;  %s593_s13 = smov 8  }
 0x12a   :  { %361 = dma.vmem_to_hbm [thread:$0]  %s356_s2, 3200, %s845_s3, [#allocation3], %s592_s1, %s592_s1, %s593_s13  }
 0x12b   :  { %586 = dma.done.wait [#allocation3], 3200  }
 0x12c   :  { %587 = vsyncadd [#allocation3], 4294964096 }
 0x12d   :  { %365 = vsyncpa [#allocation3], 1 }

</bundles_post_ra>
